<compile_context>
chip_gen: v6e
topology: v6e:2x2x1
jax: 0.10.0
libtpu: 0.0.40
codegen_flags: <defaults>
</compile_context>

<pallas_src>
import math
import jax
import jax.numpy as jnp
from jax.experimental import pallas as pl
from jax.experimental.pallas import tpu as pltpu


def deepfm_forward(x_idx, params, tb_max=512):
    """x_idx: (B, F) int32 indices into the shared embedding tables."""
    emb_tbl = params["embeddings"]       # (N, K)
    fc_tbl  = params["fc"]               # (N, 1)

    B, F = x_idx.shape
    K = emb_tbl.shape[1]
    FK = F * K
    H1 = params["w1"].shape[1]
    H2 = params["w2"].shape[1]

    # ---- glue: embedding gathers + layout plumbing (plain JAX) -------------
    embed_x = emb_tbl[x_idx]                          # (B, F, K)
    fc_x    = fc_tbl[x_idx, 0]                        # (B, F)
    slab    = jnp.concatenate([embed_x.reshape(B, FK), fc_x], axis=1)  # (B, FK+F)

    D  = FK + F
    Dp = ((D + 127) // 128) * 128                     # lane-pad feature dim

    # Batch tiling: TB up to tb_max (multiple of 128 when tiled, else full batch).
    if B <= tb_max:
        TB = max(8, ((B + 7) // 8) * 8)
        Bp = TB
    else:
        TB = tb_max                                    # multiple of 128
        Bp = ((B + TB - 1) // TB) * TB
    grid_n = Bp // TB

    slab_p = jnp.pad(slab, ((0, Bp - B), (0, Dp - D)))
    xT = slab_p.T                                      # (Dp, Bp): batch on lanes

    # MLP weights, pre-transposed / padded so matmuls are (H, Dp) @ (Dp, TB).
    w1T = jnp.pad(params["w1"], ((0, Dp - FK), (0, 0))).T   # (H1, Dp); fc/pad cols zeroed
    b1c = params["b1"].reshape(H1, 1)                        # (H1, 1)
    w2T = params["w2"].T                                     # (H2, H1)
    b2c = params["b2"].reshape(H2, 1)                        # (H2, 1)
    w3c = params["w3"]                                       # (H2, 1)

    # True scalars -> SMEM: [w_lin, b_lin, b3]
    scalars = jnp.concatenate([params["w_lin"].reshape(-1),
                               params["b_lin"].reshape(-1),
                               params["b3"].reshape(-1)]).astype(jnp.float32)

    def kernel(x_ref, sc_ref, w1t_ref, b1_ref, w2t_ref, b2_ref, w3_ref,
               prob_ref, mlp_ref):
        xt = x_ref[...]                                # (Dp, TB), batch on lanes
        tb = xt.shape[1]

        # ---- FM second-order interaction term (per-field static unroll) ----
        sum_f  = jnp.zeros((K, tb), jnp.float32)
        sum_sq = jnp.zeros((K, tb), jnp.float32)
        for f in range(F):                             # F is small & static
            v = xt[f * K:(f + 1) * K, :]               # (K, TB)
            sum_f  = sum_f + v
            sum_sq = sum_sq + v * v
        fm = 0.5 * jnp.sum(sum_f * sum_f - sum_sq, axis=0, keepdims=True)  # (1, TB)

        # ---- first-order term: Linear(1,1)(fc(x).sum(dim=1)) ---------------
        fc_sum = jnp.sum(xt[FK:FK + F, :], axis=0, keepdims=True)          # (1, TB)
        logits = fc_sum * sc_ref[0] + sc_ref[1] + fm
        prob = jax.nn.sigmoid(logits)                                      # (1, TB)
        prob_ref[...] = jnp.broadcast_to(prob, (8, tb))

        # ---- MLP tower (discarded from logits, matching the PyTorch bug) ---
        # TODO(synk): dropout treated as identity (eval mode); no RNG in kernel.
        h = jnp.dot(w1t_ref[...], xt, preferred_element_type=jnp.float32) + b1_ref[...]
        h = jnp.maximum(h, 0.0)                                            # (H1, TB)
        h = jnp.dot(w2t_ref[...], h, preferred_element_type=jnp.float32) + b2_ref[...]
        h = jnp.maximum(h, 0.0)                                            # (H2, TB)
        mlp = jnp.sum(h * w3_ref[...], axis=0, keepdims=True) + sc_ref[2]  # (1, TB)
        mlp_ref[...] = jnp.broadcast_to(mlp, (8, tb))

    rep = lambda i: (0, 0)   # replicated parameter blocks (fetched once)

    prob8, mlp8 = pl.pallas_call(
        kernel,
        out_shape=(jax.ShapeDtypeStruct((8, Bp), jnp.float32),
                   jax.ShapeDtypeStruct((8, Bp), jnp.float32)),
        grid_spec=pltpu.PrefetchScalarGridSpec(
            num_scalar_prefetch=0,
            grid=(grid_n,),
            in_specs=[
                pl.BlockSpec((Dp, TB), lambda i: (0, i)),            # xT batch tile
                pl.BlockSpec(memory_space=pltpu.MemorySpace.SMEM),   # [w_lin,b_lin,b3]
                pl.BlockSpec((H1, Dp), rep),                         # w1^T (padded)
                pl.BlockSpec((H1, 1),  rep),                         # b1
                pl.BlockSpec((H2, H1), rep),                         # w2^T
                pl.BlockSpec((H2, 1),  rep),                         # b2
                pl.BlockSpec((H2, 1),  rep),                         # w3 (column)
            ],
            out_specs=(
                pl.BlockSpec((8, TB), lambda i: (0, i)),
                pl.BlockSpec((8, TB), lambda i: (0, i)),
            ),
        ),
        compiler_params=pltpu.CompilerParams(
            dimension_semantics=("parallel",),
            vmem_limit_bytes=32 * 1024 * 1024),
    )(xT, scalars, w1T, b1c, w2T, b2c, w3c)

    prob = prob8[0, :B]                     # (B,)
    mlp_out = mlp8[0, :B].reshape(B, 1)     # (B, 1) -- intentionally unused in logits
    return prob, mlp_out


def xavier_uniform(key, shape):
    if len(shape) == 2:
        fan_out, fan_in = shape[0], shape[1]
    else:
        fan_out = fan_in = shape[-1]
    bound = math.sqrt(6.0 / (fan_in + fan_out))
    return jax.random.uniform(key, shape, jnp.float32, -bound, bound)


def init_params(key, field_dims, num_factors, mlp_dims):
    num_inputs = int(sum(field_dims))
    F = len(field_dims)
    in_dim = F * num_factors
    keys = jax.random.split(key, 16)
    p = {}
    p["embeddings"] = xavier_uniform(keys[0], (num_inputs, num_factors))
    p["fc"]         = xavier_uniform(keys[1], (num_inputs, 1))
    p["w_lin"]      = xavier_uniform(keys[2], (1, 1))
    p["b_lin"]      = jax.random.uniform(keys[3], (1, 1), jnp.float32, -1.0, 1.0)
    # MLP: Linear(in,H1)->ReLU->Dropout->Linear(H1,H2)->ReLU->Dropout->Linear(H2,1)
    dims = [in_dim] + list(mlp_dims) + [1]
    names = [("w1", "b1"), ("w2", "b2"), ("w3", "b3")]
    for li, (wn, bn) in enumerate(names):
        din, dout = dims[li], dims[li + 1]
        # PyTorch Linear stores (out, in); xavier bound is symmetric, store as (in, out).
        p[wn] = xavier_uniform(keys[4 + 2 * li], (din, dout))
        bb = 1.0 / math.sqrt(din)
        p[bn] = jax.random.uniform(keys[5 + 2 * li], (1, dout), jnp.float32, -bb, bb)
    return p


def reference_forward(x_idx, params):
    """Pure-JAX reference mirroring the PyTorch forward (eval mode)."""
    emb = params["embeddings"][x_idx]                       # (B, F, K)
    square_of_sum = jnp.sum(emb, axis=1) ** 2
    sum_of_square = jnp.sum(emb ** 2, axis=1)
    fc_sum = jnp.sum(params["fc"][x_idx], axis=1)           # (B, 1)
    lin = fc_sum @ params["w_lin"].T + params["b_lin"][0]   # (B, 1)
    x = lin + 0.5 * jnp.sum(square_of_sum - sum_of_square, axis=1, keepdims=True)
    # `+ self.mlp(inputs)` in the original code is a no-op statement -> not added.
    return jax.nn.sigmoid(x).squeeze()


def reference_mlp(x_idx, params):
    emb = params["embeddings"][x_idx]
    B = x_idx.shape[0]
    flat = emb.reshape(B, -1)
    hp = jax.lax.Precision.HIGHEST
    h = jnp.maximum(jnp.dot(flat, params["w1"], precision=hp) + params["b1"], 0.0)
    h = jnp.maximum(jnp.dot(h, params["w2"], precision=hp) + params["b2"], 0.0)
    return jnp.dot(h, params["w3"], precision=hp) + params["b3"]


if __name__ == "__main__":
    field_dims = [10, 20, 30, 40]     # 4 fields, vocab = 100
    num_factors = 16
    mlp_dims = (32, 16)
    B = 8

    key = jax.random.PRNGKey(0)
    kp, kx = jax.random.split(key)
    params = init_params(kp, field_dims, num_factors, mlp_dims)

    num_inputs = int(sum(field_dims))
    x_idx = jax.random.randint(kx, (B, len(field_dims)), 0, num_inputs, dtype=jnp.int32)

    prob, mlp_out = deepfm_forward(x_idx, params)
    prob = jax.block_until_ready(prob)
    mlp_out = jax.block_until_ready(mlp_out)

    ref = reference_forward(x_idx, params)
    ref_mlp = reference_mlp(x_idx, params)
    assert prob.shape == (B,)
    assert jnp.allclose(prob, ref, atol=1e-5, rtol=1e-5), (prob, ref)
    assert jnp.allclose(mlp_out, ref_mlp, atol=1e-3, rtol=1e-3)
    print("KERNEL_OK")
</pallas_src>

<mosaic_0001>
module attributes {stable_mosaic.version = 11 : i64} {
  func.func @kernel(%arg0: i32, %arg1: memref<128x8xf32, #tpu.memory_space<vmem>>, %arg2: memref<3xf32, #tpu.memory_space<smem>>, %arg3: memref<32x128xf32, #tpu.memory_space<vmem>>, %arg4: memref<32x1xf32, #tpu.memory_space<vmem>>, %arg5: memref<16x32xf32, #tpu.memory_space<vmem>>, %arg6: memref<16x1xf32, #tpu.memory_space<vmem>>, %arg7: memref<16x1xf32, #tpu.memory_space<vmem>>, %arg8: memref<8x8xf32, #tpu.memory_space<vmem>>, %arg9: memref<8x8xf32, #tpu.memory_space<vmem>>) attributes {dimension_semantics = [#tpu.dimension_semantics<parallel>], iteration_bounds = array<i64: 1>, scalar_prefetch = 0 : i64, scratch_operands = 0 : i64, tpu.core_type = #tpu.core_type<tc>, window_params = [{transform_indices = @transform_0, window_bounds = array<i64: 128, 8>}, {transform_indices = @transform_1, window_bounds = array<i64: 3>}, {pipeline_mode = #tpu.pipeline_mode<synchronous>, transform_indices = @transform_2, window_bounds = array<i64: 32, 128>}, {pipeline_mode = #tpu.pipeline_mode<synchronous>, transform_indices = @transform_3, window_bounds = array<i64: 32, 1>}, {pipeline_mode = #tpu.pipeline_mode<synchronous>, transform_indices = @transform_4, window_bounds = array<i64: 16, 32>}, {pipeline_mode = #tpu.pipeline_mode<synchronous>, transform_indices = @transform_5, window_bounds = array<i64: 16, 1>}, {pipeline_mode = #tpu.pipeline_mode<synchronous>, transform_indices = @transform_6, window_bounds = array<i64: 16, 1>}, {transform_indices = @transform_7, window_bounds = array<i64: 8, 8>}, {transform_indices = @transform_8, window_bounds = array<i64: 8, 8>}]} {
    %c0 = arith.constant 0 : index
    %c0_0 = arith.constant 0 : index
    %0 = vector.load %arg1[%c0, %c0_0] : memref<128x8xf32, #tpu.memory_space<vmem>>, vector<128x8xf32>
    %cst = arith.constant 0.000000e+00 : f32
    %1 = vector.broadcast %cst : f32 to vector<16x8xf32>
    %cst_1 = arith.constant 0.000000e+00 : f32
    %2 = vector.broadcast %cst_1 : f32 to vector<16x8xf32>
    %3 = vector.extract_strided_slice %0 {offsets = [0, 0], sizes = [16, 8], strides = [1, 1]} : vector<128x8xf32> to vector<16x8xf32>
    %4 = arith.addf %1, %3 : vector<16x8xf32>
    %5 = arith.mulf %3, %3 : vector<16x8xf32>
    %6 = arith.addf %2, %5 : vector<16x8xf32>
    %7 = vector.extract_strided_slice %0 {offsets = [16, 0], sizes = [16, 8], strides = [1, 1]} : vector<128x8xf32> to vector<16x8xf32>
    %8 = arith.addf %4, %7 : vector<16x8xf32>
    %9 = arith.mulf %7, %7 : vector<16x8xf32>
    %10 = arith.addf %6, %9 : vector<16x8xf32>
    %11 = vector.extract_strided_slice %0 {offsets = [32, 0], sizes = [16, 8], strides = [1, 1]} : vector<128x8xf32> to vector<16x8xf32>
    %12 = arith.addf %8, %11 : vector<16x8xf32>
    %13 = arith.mulf %11, %11 : vector<16x8xf32>
    %14 = arith.addf %10, %13 : vector<16x8xf32>
    %15 = vector.extract_strided_slice %0 {offsets = [48, 0], sizes = [16, 8], strides = [1, 1]} : vector<128x8xf32> to vector<16x8xf32>
    %16 = arith.addf %12, %15 : vector<16x8xf32>
    %17 = arith.mulf %15, %15 : vector<16x8xf32>
    %18 = arith.addf %14, %17 : vector<16x8xf32>
    %19 = arith.mulf %16, %16 : vector<16x8xf32>
    %20 = arith.subf %19, %18 : vector<16x8xf32>
    %cst_2 = arith.constant dense<0.000000e+00> : vector<8xf32>
    %21 = vector.multi_reduction <add>, %20, %cst_2 [0] : vector<16x8xf32> to vector<8xf32>
    %22 = vector.shape_cast %21 : vector<8xf32> to vector<1x8xf32>
    %cst_3 = arith.constant 5.000000e-01 : f32
    %23 = vector.broadcast %cst_3 : f32 to vector<1x8xf32>
    %24 = arith.mulf %23, %22 : vector<1x8xf32>
    %25 = vector.extract_strided_slice %0 {offsets = [64, 0], sizes = [4, 8], strides = [1, 1]} : vector<128x8xf32> to vector<4x8xf32>
    %cst_4 = arith.constant dense<0.000000e+00> : vector<8xf32>
    %26 = vector.multi_reduction <add>, %25, %cst_4 [0] : vector<4x8xf32> to vector<8xf32>
    %27 = vector.shape_cast %26 : vector<8xf32> to vector<1x8xf32>
    %c0_5 = arith.constant 0 : index
    %28 = memref.load %arg2[%c0_5] : memref<3xf32, #tpu.memory_space<smem>>
    %29 = vector.broadcast %28 : f32 to vector<1x8xf32>
    %30 = arith.mulf %27, %29 : vector<1x8xf32>
    %c1 = arith.constant 1 : index
    %31 = memref.load %arg2[%c1] : memref<3xf32, #tpu.memory_space<smem>>
    %32 = vector.broadcast %31 : f32 to vector<1x8xf32>
    %33 = arith.addf %30, %32 : vector<1x8xf32>
    %34 = arith.addf %33, %24 : vector<1x8xf32>
    %35 = arith.negf %34 : vector<1x8xf32>
    %36 = math.exp %35 : vector<1x8xf32>
    %cst_6 = arith.constant 1.000000e+00 : f32
    %37 = vector.broadcast %cst_6 : f32 to vector<1x8xf32>
    %38 = arith.addf %37, %36 : vector<1x8xf32>
    %39 = arith.divf %37, %38 : vector<1x8xf32>
    %40 = vector.shape_cast %39 : vector<1x8xf32> to vector<1x8xf32>
    %41 = vector.broadcast %40 : vector<1x8xf32> to vector<8x8xf32>
    %c0_7 = arith.constant 0 : index
    %c0_8 = arith.constant 0 : index
    %42 = vector.load %arg8[%c0_7, %c0_8] : memref<8x8xf32, #tpu.memory_space<vmem>>, vector<8x8xf32>
    tpu.vector_store %arg8[%c0_7, %c0_8], %41 {strides = array<i32>} : memref<8x8xf32, #tpu.memory_space<vmem>>, vector<8x8xf32>,
    %c0_9 = arith.constant 0 : index
    %c0_10 = arith.constant 0 : index
    %43 = vector.load %arg3[%c0_9, %c0_10] : memref<32x128xf32, #tpu.memory_space<vmem>>, vector<32x128xf32>
    %cst_11 = arith.constant dense<0.000000e+00> : vector<32x8xf32>
    %44 = tpu.matmul %43, %0, %cst_11 {dimension_numbers = #tpu.dot_dimension_numbers<[1], [0], [0], [1], [0, 0, 1, 1], [], []>} : vector<32x128xf32>, vector<128x8xf32>, vector<32x8xf32> -> vector<32x8xf32>
    %c0_12 = arith.constant 0 : index
    %c0_13 = arith.constant 0 : index
    %45 = vector.load %arg4[%c0_12, %c0_13] : memref<32x1xf32, #tpu.memory_space<vmem>>, vector<32x1xf32>
    %46 = vector.broadcast %45 : vector<32x1xf32> to vector<32x8xf32>
    %47 = arith.addf %44, %46 : vector<32x8xf32>
    %cst_14 = arith.constant 0.000000e+00 : f32
    %48 = vector.broadcast %cst_14 : f32 to vector<32x8xf32>
    %49 = arith.maximumf %47, %48 : vector<32x8xf32>
    %c0_15 = arith.constant 0 : index
    %c0_16 = arith.constant 0 : index
    %50 = vector.load %arg5[%c0_15, %c0_16] : memref<16x32xf32, #tpu.memory_space<vmem>>, vector<16x32xf32>
    %cst_17 = arith.constant dense<0.000000e+00> : vector<16x8xf32>
    %51 = tpu.matmul %50, %49, %cst_17 {dimension_numbers = #tpu.dot_dimension_numbers<[1], [0], [0], [1], [0, 0, 1, 1], [], []>} : vector<16x32xf32>, vector<32x8xf32>, vector<16x8xf32> -> vector<16x8xf32>
    %c0_18 = arith.constant 0 : index
    %c0_19 = arith.constant 0 : index
    %52 = vector.load %arg6[%c0_18, %c0_19] : memref<16x1xf32, #tpu.memory_space<vmem>>, vector<16x1xf32>
    %53 = vector.broadcast %52 : vector<16x1xf32> to vector<16x8xf32>
    %54 = arith.addf %51, %53 : vector<16x8xf32>
    %cst_20 = arith.constant 0.000000e+00 : f32
    %55 = vector.broadcast %cst_20 : f32 to vector<16x8xf32>
    %56 = arith.maximumf %54, %55 : vector<16x8xf32>
    %c0_21 = arith.constant 0 : index
    %c0_22 = arith.constant 0 : index
    %57 = vector.load %arg7[%c0_21, %c0_22] : memref<16x1xf32, #tpu.memory_space<vmem>>, vector<16x1xf32>
    %58 = vector.broadcast %57 : vector<16x1xf32> to vector<16x8xf32>
    %59 = arith.mulf %56, %58 : vector<16x8xf32>
    %cst_23 = arith.constant dense<0.000000e+00> : vector<8xf32>
    %60 = vector.multi_reduction <add>, %59, %cst_23 [0] : vector<16x8xf32> to vector<8xf32>
    %61 = vector.shape_cast %60 : vector<8xf32> to vector<1x8xf32>
    %c2 = arith.constant 2 : index
    %62 = memref.load %arg2[%c2] : memref<3xf32, #tpu.memory_space<smem>>
    %63 = vector.broadcast %62 : f32 to vector<1x8xf32>
    %64 = arith.addf %61, %63 : vector<1x8xf32>
    %65 = vector.shape_cast %64 : vector<1x8xf32> to vector<1x8xf32>
    %66 = vector.broadcast %65 : vector<1x8xf32> to vector<8x8xf32>
    %c0_24 = arith.constant 0 : index
    %c0_25 = arith.constant 0 : index
    %67 = vector.load %arg9[%c0_24, %c0_25] : memref<8x8xf32, #tpu.memory_space<vmem>>, vector<8x8xf32>
    tpu.vector_store %arg9[%c0_24, %c0_25], %66 {strides = array<i32>} : memref<8x8xf32, #tpu.memory_space<vmem>>, vector<8x8xf32>,
    return
  }
  func.func @transform_0(%arg0: i32) -> (i32, i32) {
    %c0_i32 = arith.constant 0 : i32
    %c0_i32_0 = arith.constant 0 : i32
    return %c0_i32, %arg0 : i32, i32
  }
  func.func @transform_1(%arg0: i32) -> i32 {
    %c0_i32 = arith.constant 0 : i32
    %c0_i32_0 = arith.constant 0 : i32
    return %c0_i32 : i32
  }
  func.func @transform_2(%arg0: i32) -> (i32, i32) {
    %c0_i32 = arith.constant 0 : i32
    %c0_i32_0 = arith.constant 0 : i32
    %c0_i32_1 = arith.constant 0 : i32
    return %c0_i32, %c0_i32_0 : i32, i32
  }
  func.func @transform_3(%arg0: i32) -> (i32, i32) {
    %c0_i32 = arith.constant 0 : i32
    %c0_i32_0 = arith.constant 0 : i32
    %c0_i32_1 = arith.constant 0 : i32
    return %c0_i32, %c0_i32_0 : i32, i32
  }
  func.func @transform_4(%arg0: i32) -> (i32, i32) {
    %c0_i32 = arith.constant 0 : i32
    %c0_i32_0 = arith.constant 0 : i32
    %c0_i32_1 = arith.constant 0 : i32
    return %c0_i32, %c0_i32_0 : i32, i32
  }
  func.func @transform_5(%arg0: i32) -> (i32, i32) {
    %c0_i32 = arith.constant 0 : i32
    %c0_i32_0 = arith.constant 0 : i32
    %c0_i32_1 = arith.constant 0 : i32
    return %c0_i32, %c0_i32_0 : i32, i32
  }
  func.func @transform_6(%arg0: i32) -> (i32, i32) {
    %c0_i32 = arith.constant 0 : i32
    %c0_i32_0 = arith.constant 0 : i32
    %c0_i32_1 = arith.constant 0 : i32
    return %c0_i32, %c0_i32_0 : i32, i32
  }
  func.func @transform_7(%arg0: i32) -> (i32, i32) {
    %c0_i32 = arith.constant 0 : i32
    %c0_i32_0 = arith.constant 0 : i32
    return %c0_i32, %arg0 : i32, i32
  }
  func.func @transform_8(%arg0: i32) -> (i32, i32) {
    %c0_i32 = arith.constant 0 : i32
    %c0_i32_0 = arith.constant 0 : i32
    return %c0_i32, %arg0 : i32, i32
  }
}

</mosaic_0001>

<bundles_post_ra>
// kernel: tpu_custom_call.1
= control target key start
LH: loop header
LB: loop body
LE: loop exit
PB: predicated region body
PF: predicated region fallthrough
CT: control target
= control target key end

     0   :  { %14 = vsyncpa [#allocation4], 0  ;;  %s742_s0 = inlined_call_operand.vmem [shape: f32[128,8], index: 0, kind: input, shape index: {}]   ;;  %s743_s1 = inlined_call_operand.vmem [shape: f32[3], index: 1, kind: input, shape index: {}]   ;;  %s744_s2 = inlined_call_operand.vmem [shape: f32[32,128], index: 2, kind: input, shape index: {}]   ;;  %s745_s3 = inlined_call_operand.vmem [shape: f32[32,1], index: 3, kind: input, shape index: {}]   ;;  %s746_s4 = inlined_call_operand.vmem [shape: f32[16,32], index: 4, kind: input, shape index: {}]   ;;  %s747_s5 = inlined_call_operand.vmem [shape: f32[16,1], index: 5, kind: input, shape index: {}]   ;;  %s748_s6 = inlined_call_operand.vmem [shape: f32[16,1], index: 6, kind: input, shape index: {}]   ;;  %s749_s7 = inlined_call_operand.hbm [shape: f32[8,8], index: 7, kind: output, shape index: {0}]   ;;  %s750_s8 = inlined_call_operand.hbm [shape: f32[8,8], index: 8, kind: output, shape index: {1}]  }
   0x1   :  { %15 = vsyncpa [#allocation3], 0 }
   0x2   :  { %16 = vsyncpa [#allocation7], 0  ;;  %s25_s29 = sshll.u32 %s743_s1, 4  ;;  %s26_s29 = int_to_ptr.vmem [resolvable:$true] %s25_s29 }
   0x3   :  { %s481_s30 = scalar_lea.vmem %s26_s29, 16  ;;  %p486_p1 = scmp.lt.s32.totalorder %s26_s29, %s26_s29 }
   0x4   :  { %p482_p0 = scmp.ne.s32.totalorder %s26_s29, %s481_s30  ;;  %p487_p2 = scmp.lt.s32.totalorder %s481_s30, %s481_s30 }
   0x6   :  { %p488_p3 = por %p487_p2, %p486_p1 }
   0x8   :  { %p489_p4 = pnand %p488_p3, %p482_p0 }
   0xa   :  { %492 = shalt.err (!%p489_p4)
}
   0xb   :  { %s539_s9 = smov [#allocation2]  }
   0xc   :  { %28 = dma.vmem_to_smem %s26_s29, 16, %s539_s9, [#allocation4]  }
   0xd   :  { %533 = dma.done.wait [#allocation4], 16  }
   0xe   :  { %534 = vsyncadd [#allocation4], 4294967280 }
   0xf   :  { %42 = sfence }
  0x10   :  { %v58_v0 = vld [vmem:[%s742_s0 + $0x78] sm:$0xff]  ;;  %v57_v1 = vld [vmem:[%s742_s0 + $0x70] sm:$0xff]  ;;  %v56_v2 = vld [vmem:[%s742_s0 + $0x68] sm:$0xff]  ;;  %v540_v3 = vmov 0   ;;  %vm251_vm0 = vcmask 261120   ;;  %vm87_vm1 = vcmask 64512  }
  0x11   :  { %422 = vmatprep.subr.mxu0 %v58_v0  ;;  %475 = vset.pattern.permute.xlu0 %v540_v3  ;;  %v55_v4 = vld [vmem:[%s742_s0 + $0x60] sm:$0xff]  ;;  %v606_v5 = vld [vmem:[%s742_s0 + $0x28] sm:$0xff]  ;;  %v613_v7 = vld [vmem:[%s742_s0 + $0x18] sm:$0xff]  ;;  %vm98_vm2 = vcmask 60416   ;;  %s106_s18 = sld [smem:[#allocation2]] }
  0x12   :  { %423 = vmatpush3.msra.mxu0 %v58_v0  ;;  %476 = vset.pattern.permute.xlu1 %v540_v3  ;;  %v74_v6 = vmul.f32 %v606_v5, %v606_v5  ;;  %v618_v8 = vld [vmem:[%s742_s0 + $0x10] sm:$0xff]  ;;  %v623_v9 = vld [vmem:[%s742_s0 + $0x8] sm:$0xff]  ;;  %v628_v10 = vld [vmem:[%s742_s0 + $0x20] sm:$0xff]  ;;  %v68_v11 = vmul.f32 %v613_v7, %v613_v7  ;;  %s391_s19 = sld [smem:[#allocation2 + $0x1]] }
  0x13   :  { %424 = vmatprep.subr.mxu0 %v57_v1  ;;  %v67_v12 = vmul.f32 %v618_v8, %v618_v8  ;;  %v62_v13 = vmul.f32 %v623_v9, %v623_v9  ;;  %v66_v14 = vadd.f32 %v613_v7, %v623_v9  ;;  %v641_v15 = vld [vmem:[%s742_s0] sm:$0xff]  ;;  %v54_v17 = vld [vmem:[%s742_s0 + $0x58] sm:$0xff]  ;;  %v73_v19 = vmul.f32 %v628_v10, %v628_v10  ;;  %v49_v24 = vld [vmem:[%s742_s0 + $0x30] sm:$0xff] }
  0x14   :  { %425 = vmatpush3.msra.mxu0 %v57_v1  ;;  %v120_v16 = vld [vmem:[%s744_s2] sm:$0xff]  ;;  %v50_v18 = vld [vmem:[%s742_s0 + $0x38] sm:$0xff]  ;;  %v61_v20 = vmul.f32 %v641_v15, %v641_v15  ;;  %v65_v21 = vadd.f32 %v618_v8, %v641_v15  ;;  %v125_v27 = vld [vmem:[%s745_s3 + $0x8] sm:$0xff]  ;;  %v79_v29 = vmul.f32 %v49_v24, %v49_v24 }
  0x15   :  { %426 = vmatprep.subr.mxu0 %v56_v2  ;;  %454 = vmatprep.mubr.f32.mxu0 %v120_v16  ;;  %v127_v22 = vld [vmem:[%s745_s3 + $0x18] sm:$0xff]  ;;  %v80_v23 = vmul.f32 %v50_v18, %v50_v18  ;;  %v70_v25 = vadd.f32 %v68_v11, %v62_v13  ;;  %v72_v26 = vadd.f32 %v66_v14, %v606_v5  ;;  %v53_v28 = vld [vmem:[%s742_s0 + $0x50] sm:$0xff]  ;;  %v124_v35 = vld [vmem:[%s745_s3] sm:$0xff] }
  0x16   :  { %427 = vmatpush3.msra.mxu0 %v56_v2  ;;  %145 = vperm.xlu0 %475, %v127_v22   ;;  %v69_v30 = vadd.f32 %v67_v12, %v61_v20  ;;  %v71_v31 = vadd.f32 %v65_v21, %v628_v10  ;;  %v126_v32 = vld [vmem:[%s745_s3 + $0x10] sm:$0xff]  ;;  %v52_v36 = vld [vmem:[%s742_s0 + $0x48] sm:$0xff]  ;;  %v684_v41 = vld [vmem:[%s742_s0 + $0x40] sm:$0xff] }
  0x17   :  { %428 = vmatprep.subr.mxu0 %v55_v4  ;;  %135 = vperm.xlu1 %476, %v125_v27   ;;  %v76_v33 = vadd.f32 %v74_v6, %v70_v25  ;;  %v78_v34 = vadd.f32 %v72_v26, %v50_v18  ;;  %v239_v44 = vld [vmem:[%s747_s5] sm:$0xff]  ;;  %v240_v46 = vld [vmem:[%s747_s5 + $0x8] sm:$0xff]  ;;  %v122_v51 = vld [vmem:[%s744_s2 + $0x10] sm:$0xff] }
  0x18   :  { %429 = vmatpush3.msra.mxu0 %v55_v4  ;;  %v75_v37 = vadd.f32 %v73_v19, %v69_v30  ;;  %v77_v38 = vadd.f32 %v71_v31, %v49_v24  ;;  %v335_v48 = vld [vmem:[%s748_s6] sm:$0xff]  ;;  %v336_v49 = vld [vmem:[%s748_s6 + $0x8] sm:$0xff]  ;;  %v123_v52 = vld [vmem:[%s744_s2 + $0x18] sm:$0xff]  ;;  %v107_v19 = vstv %s106_s18 }
  0x19   :  { %430 = vmatprep.subr.mxu0 %v54_v17  ;;  %v82_v39 = vadd.f32 %v80_v23, %v76_v33  ;;  %v84_v40 = vmul.f32 %v78_v34, %v78_v34  ;;  %v121_v50 = vld [vmem:[%s744_s2 + $0x8] sm:$0xff]  ;;  %v237_v53 = vld [vmem:[%s746_s4] sm:$0xff]  ;;  %v110_v23 = vstv %s391_s19 }
  0x1a   :  { %431 = vmatpush3.msra.mxu0 %v54_v17  ;;  %140 = vperm.xlu0 %475, %v126_v32   ;;  %v81_v42 = vadd.f32 %v79_v29, %v75_v37  ;;  %v83_v43 = vmul.f32 %v77_v38, %v77_v38 }
  0x1b   :  { %432 = vmatprep.subr.mxu0 %v53_v28  ;;  %130 = vperm.xlu1 %476, %v124_v35   ;;  %v86_v45 = vsub.f32 %v84_v40, %v82_v39 }
  0x1c   :  { %433 = vmatpush3.msra.mxu0 %v53_v28  ;;  %v85_v47 = vsub.f32 %v83_v43, %v81_v42  ;;  %468 = vmatprep.mubr.msk.f32.mxu1 %vm251_vm0, %v237_v53 }
  0x1d   :  { %434 = vmatprep.subr.mxu0 %v52_v36  ;;  %v89_v55 = vsel %vm87_vm1, %v86_v45, 0.0 }
  0x1e   :  { %435 = vmatpush3.msra.mxu0 %v52_v36  ;;  %243 = vperm.xlu0 %475, %v239_v44   ;;  %v88_v54 = vsel %vm87_vm1, %v85_v47, 0.0 }
  0x1f   :  { %436 = vmatprep.subr.mxu0 %v684_v41  ;;  %248 = vperm.xlu1 %476, %v240_v46   ;;  %v90_v56 = vadd.f32 %v89_v55, %v88_v54 }
  0x20   :  { %437 = vmatpush3.msra.mxu0 %v684_v41 }
  0x21   :  { %438 = vmatprep.subr.mxu0 %v50_v18  ;;  %v91_v16 = vrot.slane %v90_v56, 4 }
  0x22   :  { %439 = vmatpush3.msra.mxu0 %v50_v18  ;;  %339 = vperm.xlu0 %475, %v335_v48  }
  0x23   :  { %440 = vmatprep.subr.mxu0 %v49_v24  ;;  %344 = vperm.xlu1 %476, %v336_v49   ;;  %v92_v18 = vadd.f32 %v91_v16, %v90_v56 }
  0x24   :  { %441 = vmatpush3.msra.mxu0 %v49_v24 }
  0x25   :  { %442 = vmatprep.subr.mxu0 %v606_v5  ;;  %v93_v20 = vrot.slane %v92_v18, 2 }
  0x26   :  { %443 = vmatpush3.msra.mxu0 %v606_v5 }
  0x27   :  { %444 = vmatprep.subr.mxu0 %v628_v10  ;;  %v94_v22 = vadd.f32 %v93_v20, %v92_v18 }
  0x28   :  { %445 = vmatpush3.msra.mxu0 %v628_v10  ;;  %v99_v10 = vsel %vm98_vm2, %v684_v41, 0.0 }
  0x29   :  { %446 = vmatprep.subr.mxu0 %v613_v7  ;;  %v100_v11 = vrot.slane %v99_v10, 4  ;;  %v95_v24 = vrot.slane %v94_v22, 1 }
  0x2a   :  { %447 = vmatpush3.msra.mxu0 %v613_v7 }
  0x2b   :  { %448 = vmatprep.subr.mxu0 %v618_v8  ;;  %v101_v12 = vadd.f32 %v100_v11, %v99_v10  ;;  %v96_v26 = vadd.f32 %v95_v24, %v94_v22 }
  0x2c   :  { %449 = vmatpush3.msra.mxu0 %v618_v8 }
  0x2d   :  { %450 = vmatprep.subr.mxu0 %v623_v9  ;;  %v102_v13 = vrot.slane %v101_v12, 2  ;;  %v97_v27 = vmul.f32 0.5, %v96_v26 }
  0x2e   :  { %451 = vmatpush3.msra.mxu0 %v623_v9  ;;  %v238_v9 = vld [vmem:[%s746_s4 + $0x8] sm:$0xff]  ;;  %s541_s4 = smov [#allocation5]  }
  0x2f   :  { %452 = vmatprep.subr.mxu0 %v641_v15  ;;  %v103_v14 = vadd.f32 %v102_v13, %v101_v12  ;;  %s368_s20 = sshll.u32 %s541_s4, 4  ;;  %s369_s20 = int_to_ptr.vmem [resolvable:$true] %s368_s20 }
  0x30   :  { %453 = vmatpush3.msra.mxu0 %v641_v15  ;;  %s493_s21 = scalar_lea.vmem %s369_s20, 128  ;;  %p498_p6 = scmp.lt.s32.totalorder %s369_s20, %s369_s20 }
  0x31   :  { %455 = vmatmul.mubr.f32.vlgmr.msra.gmra.mxu0 %v121_v50  ;;  %v104_v15 = vrot.slane %v103_v14, 1  ;;  %p494_p5 = scmp.ne.s32.totalorder %s369_s20, %s493_s21  ;;  %p499_p7 = scmp.lt.s32.totalorder %s493_s21, %s493_s21 }
  0x32   :  { %457 = vmatprep.mubr.f32.mxu0 %v122_v51 }
  0x33   :  { %v105_v17 = vadd.f32 %v104_v15, %v103_v14  ;;  %p500_p8 = por %p499_p7, %p498_p6 }
  0x35   :  { %458 = vmatmul.mubr.f32.gmra.mxu0 %v123_v52  ;;  %v108_v21 = vmul.f32 %v107_v19, %v105_v17  ;;  %p501_p9 = pnand %p500_p8, %p494_p5 }
  0x37   :  { %v111_v25 = vadd.f32 %v110_v23, %v108_v21 }
  0x39   :  { %v112_v28 = vadd.f32 %v111_v25, %v97_v27 }
  0x3b   :  { %v392_v29 = vmul.f32 -1.442695, %v112_v28 }
  0x3d   :  { %477 = vpow2.f32 %v392_v29 }
  0x4a   :  { %v478_v30 = vpop.eup %477 }
  0x4b   :  { %v116_v31 = vadd.f32 1.0, %v478_v30 }
  0x4d   :  { %479 = vrcp.f32 %v116_v31 }
  0x5a   :  { %v480_v32 = vpop.eup %479 }
  0x5b   :  { %119 = vst.msk [vmem:[#allocation5] sm:$0xff] %vm87_vm1, %v480_v32 }
  0x91   :  { %v146_v57 = vpop.permute.xlu0 %145 }
  0x92   :  { %v136_v59 = vpop.permute.xlu1 %135 }
  0x95   :  { %v141_v63 = vpop.permute.xlu0 %140 }
  0x96   :  { %v131_v4 = vpop.permute.xlu1 %130 }
  0xf1   :  { %v456_v58 = vpop.f32.mrf.mxu0 }
  0xf2   :  { %v220_v1 = vadd.f32 %v456_v58, %v136_v59 }
  0xf3   :  { %v214_v60 = vpop.f32.mrf.mxu0 }
  0xf4   :  { %v215_v5 = vadd.f32 %v214_v60, %v131_v4  ;;  %v234_v7 = vmax.f32 %v220_v1, 0.0 }
  0xf5   :  { %v459_v61 = vpop.f32.mrf.mxu0 }
  0xf6   :  { %v230_v62 = vadd.f32 %v459_v61, %v146_v57  ;;  %v233_v8 = vmax.f32 %v215_v5, 0.0 }
  0xf7   :  { %v224_v0 = vpop.f32.mrf.mxu0 }
  0xf8   :  { %v236_v2 = vmax.f32 %v230_v62, 0.0  ;;  %v225_v3 = vadd.f32 %v224_v0, %v141_v63 }
  0xfa   :  { %v235_v6 = vmax.f32 %v225_v3, 0.0  ;;  %460 = vmatprep.subr.mxu1 %v236_v2 }
  0xfb   :  { %461 = vmatpush3.msra.mxu1 %v236_v2 }
  0xfc   :  { %462 = vmatprep.subr.mxu1 %v235_v6 }
  0xfd   :  { %463 = vmatpush3.msra.mxu1 %v235_v6 }
  0xfe   :  { %464 = vmatprep.subr.mxu1 %v234_v7 }
  0xff   :  { %465 = vmatpush3.msra.mxu1 %v234_v7 }
 0x100   :  { %466 = vmatprep.subr.mxu1 %v233_v8 }
 0x101   :  { %467 = vmatpush3.msra.mxu1 %v233_v8 }
 0x102   :  { %469 = vmatmul.mubr.msk.f32.vlgmr.msra.gmra.mxu1 %vm251_vm0, %v238_v9 }
 0x103   :  { %504 = shalt.err (!%p501_p9)
}
 0x104   :  { %371 = dma.vmem_to_hbm [thread:$0]  %s369_s20, 128, %s749_s7, [#allocation3]   ;;  %v249_v33 = vpop.permute.xlu1 %248  ;;  %v244_v34 = vpop.permute.xlu0 %243 }
 0x105   :  { %s395_s24 = sld [smem:[#allocation2 + $0x2]]  ;;  %s542_s7 = smov [#allocation6]  }
 0x106   :  { %s378_s25 = sshll.u32 %s542_s7, 4  ;;  %s379_s25 = int_to_ptr.vmem [resolvable:$true] %s378_s25 }
 0x107   :  { %s513_s26 = scalar_lea.vmem %s379_s25, 128  ;;  %p518_p11 = scmp.lt.s32.totalorder %s379_s25, %s379_s25 }
 0x108   :  { %v345_v40 = vpop.permute.xlu1 %344  ;;  %v340_v43 = vpop.permute.xlu0 %339  ;;  %p514_p10 = scmp.ne.s32.totalorder %s379_s25, %s513_s26  ;;  %p519_p12 = scmp.lt.s32.totalorder %s513_s26, %s513_s26 }
 0x10a   :  { %p520_p13 = por %p519_p12, %p518_p11 }
 0x10b   :  { %v359_v53 = vstv %s395_s24 }
 0x10c   :  { %p521_p0 = pnand %p520_p13, %p514_p10 }
 0x1c2   :  { %v470_v35 = vpop.f32.mrf.mxu1 }
 0x1c3   :  { %v330_v36 = vadd.f32 %v470_v35, %v249_v33 }
 0x1c4   :  { %v324_v37 = vpop.f32.mrf.mxu1 }
 0x1c5   :  { %v334_v38 = vmax.f32 %v330_v36, 0.0  ;;  %v325_v39 = vadd.f32 %v324_v37, %v244_v34 }
 0x1c7   :  { %v348_v41 = vmul.f32 %v345_v40, %v334_v38  ;;  %v333_v42 = vmax.f32 %v325_v39, 0.0 }
 0x1c9   :  { %v347_v44 = vmul.f32 %v340_v43, %v333_v42  ;;  %v350_v45 = vsel %vm87_vm1, %v348_v41, 0.0 }
 0x1cb   :  { %v349_v46 = vsel %vm87_vm1, %v347_v44, 0.0 }
 0x1cc   :  { %v351_v47 = vadd.f32 %v350_v45, %v349_v46 }
 0x1ce   :  { %v352_v48 = vrot.slane %v351_v47, 4 }
 0x1d0   :  { %v353_v49 = vadd.f32 %v352_v48, %v351_v47 }
 0x1d2   :  { %v354_v50 = vrot.slane %v353_v49, 2 }
 0x1d4   :  { %v355_v51 = vadd.f32 %v354_v50, %v353_v49 }
 0x1d6   :  { %v356_v52 = vrot.slane %v355_v51, 1 }
 0x1d8   :  { %v357_v54 = vadd.f32 %v356_v52, %v355_v51 }
 0x1da   :  { %v360_v55 = vadd.f32 %v359_v53, %v357_v54 }
 0x1dc   :  { %361 = vst.msk [vmem:[#allocation6] sm:$0xff] %vm87_vm1, %v360_v55 }
 0x1dd   :  { %524 = shalt.err (!%p521_p0)
}
 0x1de   :  { %381 = dma.vmem_to_hbm [thread:$0]  %s379_s25, 128, %s750_s8, [#allocation7]  }
 0x1df   :  { %535 = dma.done.wait [#allocation3], 128  }
 0x1e0   :  { %536 = vsyncadd [#allocation3], 4294967168 }
 0x1e1   :  { %537 = dma.done.wait [#allocation7], 128  }
 0x1e2   :  { %538 = vsyncadd [#allocation7], 4294967168 }
 0x1e3   :  { %388 = vsyncpa [#allocation3], 1 }
 0x1e4   :  { %389 = vsyncpa [#allocation7], 1 }
 0x1e5   :  { %390 = vsyncpa [#allocation4], 1 }

</bundles_post_ra>
